<compile_context>
chip_gen: v7x
topology: tpu7x:2x2x1
jax: 0.10.0
libtpu: 0.0.40
codegen_flags: <defaults>
</compile_context>

<pallas_src>
import jax
import jax.numpy as jnp
from jax.experimental import pallas as pl
from jax.experimental.pallas import tpu as pltpu

# Contract the last dim of both operands: (out, in) x (TB, in) -> (out, TB).
_TRANS_B = (((1,), (1,)), ((), ()))


def mlp_kernel(x_ref,
               w1_ref, b1_ref,
               w2_ref, b2_ref,
               w3_ref, b3_ref,
               w4_ref, b4_ref,
               o_ref):
    # x tile: (TB, 16). Cast is a no-op if x already arrives bf16.
    xb = x_ref[...].astype(jnp.bfloat16)

    # Layer 1 fuses the layout flip: h1^T = W1 @ x^T -> (64, TB), batch on the lane axis.
    h = jax.lax.dot_general(w1_ref[...], xb, _TRANS_B,
                            preferred_element_type=jnp.float32)
    h = jnp.maximum(h + b1_ref[...], 0.0)

    # Layer 2: (32,64) @ (64,TB) -> (32,TB)
    h = jnp.dot(w2_ref[...], h.astype(jnp.bfloat16),
                preferred_element_type=jnp.float32)
    h = jnp.maximum(h + b2_ref[...], 0.0)

    # Layer 3: (32,32) @ (32,TB) -> (32,TB)
    h = jnp.dot(w3_ref[...], h.astype(jnp.bfloat16),
                preferred_element_type=jnp.float32)
    h = jnp.maximum(h + b3_ref[...], 0.0)

    # Layer 4: (5,32) @ (32,TB) -> (5,TB)
    logits = jnp.dot(w4_ref[...], h.astype(jnp.bfloat16),
                     preferred_element_type=jnp.float32)
    logits = logits + b4_ref[...]

    # Numerically stable softmax over the feature axis (axis 0 = <=8 sublanes).
    m = jnp.max(logits, axis=0, keepdims=True)           # (1, TB)
    e = jnp.exp(logits - m)
    denom = jnp.sum(e, axis=0, keepdims=True)            # (1, TB)
    # Exact reciprocal keeps the 1e-5-class tolerance vs the reference.
    o_ref[...] = (e * pl.reciprocal(denom, approx=False)).astype(o_ref.dtype)


def _round_up(n, m):
    return ((n + m - 1) // m) * m


def _choose_tb(B, block_b):
    """Batch tile (lane width of the transposed output). None => single full-array block."""
    if B <= 128:
        return None                       # one block covering the whole (tiny) batch
    if B <= block_b:
        # v7x megacore: prefer >=2 tiles so both TensorCores get work.
        tb = min(_round_up(pl.cdiv(B, 2), 128), block_b)
        return tb if tb < B else None
    return block_b


def three_layer_mlp(x, params, block_b=512):
    """x: (B, 16) float32 (or bfloat16). params: PyTorch-native f32 weights (out,in), biases (out,)."""
    B, d_in = x.shape
    assert d_in == 16
    block_b = max(128, _round_up(block_b, 128))

    TB = _choose_tb(B, block_b)
    if TB is None:
        grid = (1,)
        x_spec = pl.BlockSpec((B, 16), lambda i: (0, 0))
        o_spec = pl.BlockSpec((5, B), lambda i: (0, 0))
    else:
        grid = (pl.cdiv(B, TB),)          # ragged last block handled by Pallas (no jnp.pad)
        x_spec = pl.BlockSpec((TB, 16), lambda i: (i, 0))
        o_spec = pl.BlockSpec((5, TB), lambda i: (0, i))

    # Weights rounded to bf16 once (~9 KB total); biases as (out, 1) f32 columns so they
    # broadcast across the lane (batch) axis. Constant index maps keep them VMEM-resident.
    weight_args = (
        params["w1"].astype(jnp.bfloat16), params["b1"].reshape(-1, 1).astype(jnp.float32),
        params["w2"].astype(jnp.bfloat16), params["b2"].reshape(-1, 1).astype(jnp.float32),
        params["w3"].astype(jnp.bfloat16), params["b3"].reshape(-1, 1).astype(jnp.float32),
        params["w4"].astype(jnp.bfloat16), params["b4"].reshape(-1, 1).astype(jnp.float32),
    )

    def _const_spec(a):
        return pl.BlockSpec(a.shape, lambda i: (0, 0))

    in_specs = [x_spec] + [_const_spec(a) for a in weight_args]

    out_t = pl.pallas_call(
        mlp_kernel,
        out_shape=jax.ShapeDtypeStruct((5, B), jnp.float32),
        grid=grid,
        in_specs=in_specs,
        out_specs=o_spec,
        compiler_params=pltpu.CompilerParams(
            dimension_semantics=("parallel",)),   # megacore sharding on v7x
    )(x, *weight_args)

    # Lane-dense (5, B) slab -> module contract (B, 5). Tiny wrapper-side transpose.
    return out_t.T


def init_params(key):
    """PyTorch nn.Linear-style init: f32 weights (out, in), biases (out,), U(+-1/sqrt(fan_in))."""
    dims = [(16, 64), (64, 32), (32, 32), (32, 5)]
    params = {}
    keys = jax.random.split(key, 2 * len(dims))
    for i, (fan_in, fan_out) in enumerate(dims):
        bound = 1.0 / jnp.sqrt(fan_in)
        w = jax.random.uniform(keys[2 * i], (fan_out, fan_in),
                               minval=-bound, maxval=bound, dtype=jnp.float32)
        b = jax.random.uniform(keys[2 * i + 1], (fan_out,),
                               minval=-bound, maxval=bound, dtype=jnp.float32)
        params[f"w{i + 1}"] = w
        params[f"b{i + 1}"] = b
    return params


def ref_forward(x, p):
    """Pure-JAX reference with the same bf16-at-matmul / f32-accumulate numerics."""
    def lin(h, w, b):
        y = jnp.dot(h.astype(jnp.bfloat16), w.astype(jnp.bfloat16).T,
                    preferred_element_type=jnp.float32)
        return y + b
    h = jnp.maximum(lin(x, p["w1"], p["b1"]), 0.0)
    h = jnp.maximum(lin(h, p["w2"], p["b2"]), 0.0)
    h = jnp.maximum(lin(h, p["w3"], p["b3"]), 0.0)
    logits = lin(h, p["w4"], p["b4"])
    return jax.nn.softmax(logits, axis=1)


if __name__ == "__main__":
    key = jax.random.PRNGKey(0)
    k_params, k_x1, k_x2 = jax.random.split(key, 3)
    params = init_params(k_params)

    # Small primary check (single full-array block).
    B = 8
    x = jax.random.normal(k_x1, (B, 16), dtype=jnp.float32)
    out = jax.block_until_ready(three_layer_mlp(x, params))
    expected = ref_forward(x, params)
    assert out.shape == (B, 5)
    assert jnp.allclose(out, expected, atol=2e-5, rtol=1e-5)
    assert jnp.allclose(jnp.sum(out, axis=1), 1.0, atol=1e-5)

    # Multi-tile grid + ragged last block (masked lane-dense stores, no wrapper pad).
    B2 = 200                               # TB=128 -> grid=(2,), second block ragged
    x2 = jax.random.normal(k_x2, (B2, 16), dtype=jnp.float32)
    out2 = jax.block_until_ready(three_layer_mlp(x2, params))
    expected2 = ref_forward(x2, params)
    assert out2.shape == (B2, 5)
    assert jnp.allclose(out2, expected2, atol=2e-5, rtol=1e-5)
    assert jnp.allclose(jnp.sum(out2, axis=1), 1.0, atol=1e-5)

    print("KERNEL_OK")
</pallas_src>

<mosaic_0001>
module attributes {stable_mosaic.version = 11 : i64} {
  func.func @mlp_kernel(%arg0: i32, %arg1: memref<8x16xf32, #tpu.memory_space<vmem>>, %arg2: memref<64x16xbf16, #tpu.memory_space<vmem>>, %arg3: memref<64x1xf32, #tpu.memory_space<vmem>>, %arg4: memref<32x64xbf16, #tpu.memory_space<vmem>>, %arg5: memref<32x1xf32, #tpu.memory_space<vmem>>, %arg6: memref<32x32xbf16, #tpu.memory_space<vmem>>, %arg7: memref<32x1xf32, #tpu.memory_space<vmem>>, %arg8: memref<5x32xbf16, #tpu.memory_space<vmem>>, %arg9: memref<5x1xf32, #tpu.memory_space<vmem>>, %arg10: memref<5x8xf32, #tpu.memory_space<vmem>>) attributes {dimension_semantics = [#tpu.dimension_semantics<parallel>], iteration_bounds = array<i64: 1>, scalar_prefetch = 0 : i64, scratch_operands = 0 : i64, tpu.core_type = #tpu.core_type<tc>, window_params = [{pipeline_mode = #tpu.pipeline_mode<synchronous>, transform_indices = @transform_0, window_bounds = array<i64: 8, 16>}, {pipeline_mode = #tpu.pipeline_mode<synchronous>, transform_indices = @transform_1, window_bounds = array<i64: 64, 16>}, {pipeline_mode = #tpu.pipeline_mode<synchronous>, transform_indices = @transform_2, window_bounds = array<i64: 64, 1>}, {pipeline_mode = #tpu.pipeline_mode<synchronous>, transform_indices = @transform_3, window_bounds = array<i64: 32, 64>}, {pipeline_mode = #tpu.pipeline_mode<synchronous>, transform_indices = @transform_4, window_bounds = array<i64: 32, 1>}, {pipeline_mode = #tpu.pipeline_mode<synchronous>, transform_indices = @transform_5, window_bounds = array<i64: 32, 32>}, {pipeline_mode = #tpu.pipeline_mode<synchronous>, transform_indices = @transform_6, window_bounds = array<i64: 32, 1>}, {pipeline_mode = #tpu.pipeline_mode<synchronous>, transform_indices = @transform_7, window_bounds = array<i64: 5, 32>}, {pipeline_mode = #tpu.pipeline_mode<synchronous>, transform_indices = @transform_8, window_bounds = array<i64: 5, 1>}, {pipeline_mode = #tpu.pipeline_mode<synchronous>, transform_indices = @transform_9, window_bounds = array<i64: 5, 8>}]} {
    %c0 = arith.constant 0 : index
    %c0_0 = arith.constant 0 : index
    %0 = vector.load %arg1[%c0, %c0_0] : memref<8x16xf32, #tpu.memory_space<vmem>>, vector<8x16xf32>
    %1 = arith.truncf %0 : vector<8x16xf32> to vector<8x16xbf16>
    %c0_1 = arith.constant 0 : index
    %c0_2 = arith.constant 0 : index
    %2 = vector.load %arg2[%c0_1, %c0_2] : memref<64x16xbf16, #tpu.memory_space<vmem>>, vector<64x16xbf16>
    %cst = arith.constant dense<0.000000e+00> : vector<64x8xf32>
    %3 = tpu.matmul %2, %1, %cst {dimension_numbers = #tpu.dot_dimension_numbers<[1], [1], [0], [0], [0, 0, 1, 0], [], []>} : vector<64x16xbf16>, vector<8x16xbf16>, vector<64x8xf32> -> vector<64x8xf32>
    %c0_3 = arith.constant 0 : index
    %c0_4 = arith.constant 0 : index
    %4 = vector.load %arg3[%c0_3, %c0_4] : memref<64x1xf32, #tpu.memory_space<vmem>>, vector<64x1xf32>
    %5 = vector.broadcast %4 : vector<64x1xf32> to vector<64x8xf32>
    %6 = arith.addf %3, %5 : vector<64x8xf32>
    %cst_5 = arith.constant 0.000000e+00 : f32
    %7 = vector.broadcast %cst_5 : f32 to vector<64x8xf32>
    %8 = arith.maximumf %6, %7 : vector<64x8xf32>
    %c0_6 = arith.constant 0 : index
    %c0_7 = arith.constant 0 : index
    %9 = vector.load %arg4[%c0_6, %c0_7] : memref<32x64xbf16, #tpu.memory_space<vmem>>, vector<32x64xbf16>
    %10 = arith.truncf %8 : vector<64x8xf32> to vector<64x8xbf16>
    %cst_8 = arith.constant dense<0.000000e+00> : vector<32x8xf32>
    %11 = tpu.matmul %9, %10, %cst_8 {dimension_numbers = #tpu.dot_dimension_numbers<[1], [0], [0], [1], [0, 0, 1, 1], [], []>} : vector<32x64xbf16>, vector<64x8xbf16>, vector<32x8xf32> -> vector<32x8xf32>
    %c0_9 = arith.constant 0 : index
    %c0_10 = arith.constant 0 : index
    %12 = vector.load %arg5[%c0_9, %c0_10] : memref<32x1xf32, #tpu.memory_space<vmem>>, vector<32x1xf32>
    %13 = vector.broadcast %12 : vector<32x1xf32> to vector<32x8xf32>
    %14 = arith.addf %11, %13 : vector<32x8xf32>
    %cst_11 = arith.constant 0.000000e+00 : f32
    %15 = vector.broadcast %cst_11 : f32 to vector<32x8xf32>
    %16 = arith.maximumf %14, %15 : vector<32x8xf32>
    %c0_12 = arith.constant 0 : index
    %c0_13 = arith.constant 0 : index
    %17 = vector.load %arg6[%c0_12, %c0_13] : memref<32x32xbf16, #tpu.memory_space<vmem>>, vector<32x32xbf16>
    %18 = arith.truncf %16 : vector<32x8xf32> to vector<32x8xbf16>
    %cst_14 = arith.constant dense<0.000000e+00> : vector<32x8xf32>
    %19 = tpu.matmul %17, %18, %cst_14 {dimension_numbers = #tpu.dot_dimension_numbers<[1], [0], [0], [1], [0, 0, 1, 1], [], []>} : vector<32x32xbf16>, vector<32x8xbf16>, vector<32x8xf32> -> vector<32x8xf32>
    %c0_15 = arith.constant 0 : index
    %c0_16 = arith.constant 0 : index
    %20 = vector.load %arg7[%c0_15, %c0_16] : memref<32x1xf32, #tpu.memory_space<vmem>>, vector<32x1xf32>
    %21 = vector.broadcast %20 : vector<32x1xf32> to vector<32x8xf32>
    %22 = arith.addf %19, %21 : vector<32x8xf32>
    %cst_17 = arith.constant 0.000000e+00 : f32
    %23 = vector.broadcast %cst_17 : f32 to vector<32x8xf32>
    %24 = arith.maximumf %22, %23 : vector<32x8xf32>
    %c0_18 = arith.constant 0 : index
    %c0_19 = arith.constant 0 : index
    %25 = vector.load %arg8[%c0_18, %c0_19] : memref<5x32xbf16, #tpu.memory_space<vmem>>, vector<5x32xbf16>
    %26 = arith.truncf %24 : vector<32x8xf32> to vector<32x8xbf16>
    %cst_20 = arith.constant dense<0.000000e+00> : vector<5x8xf32>
    %27 = tpu.matmul %25, %26, %cst_20 {dimension_numbers = #tpu.dot_dimension_numbers<[1], [0], [0], [1], [0, 0, 1, 1], [], []>} : vector<5x32xbf16>, vector<32x8xbf16>, vector<5x8xf32> -> vector<5x8xf32>
    %c0_21 = arith.constant 0 : index
    %c0_22 = arith.constant 0 : index
    %28 = vector.load %arg9[%c0_21, %c0_22] : memref<5x1xf32, #tpu.memory_space<vmem>>, vector<5x1xf32>
    %29 = vector.broadcast %28 : vector<5x1xf32> to vector<5x8xf32>
    %30 = arith.addf %27, %29 : vector<5x8xf32>
    %cst_23 = arith.constant dense<0xFF800000> : vector<8xf32>
    %31 = vector.multi_reduction <maximumf>, %30, %cst_23 [0] : vector<5x8xf32> to vector<8xf32>
    %32 = vector.shape_cast %31 : vector<8xf32> to vector<1x8xf32>
    %33 = vector.broadcast %32 : vector<1x8xf32> to vector<5x8xf32>
    %34 = arith.subf %30, %33 : vector<5x8xf32>
    %35 = math.exp %34 : vector<5x8xf32>
    %cst_24 = arith.constant dense<0.000000e+00> : vector<8xf32>
    %36 = vector.multi_reduction <add>, %35, %cst_24 [0] : vector<5x8xf32> to vector<8xf32>
    %37 = vector.shape_cast %36 : vector<8xf32> to vector<1x8xf32>
    %38 = tpu.reciprocal %37 : vector<1x8xf32> -> vector<1x8xf32>
    %39 = vector.broadcast %38 : vector<1x8xf32> to vector<5x8xf32>
    %40 = arith.mulf %35, %39 : vector<5x8xf32>
    %c0_25 = arith.constant 0 : index
    %c0_26 = arith.constant 0 : index
    %41 = vector.load %arg10[%c0_25, %c0_26] : memref<5x8xf32, #tpu.memory_space<vmem>>, vector<5x8xf32>
    tpu.vector_store %arg10[%c0_25, %c0_26], %40 {strides = array<i32>} : memref<5x8xf32, #tpu.memory_space<vmem>>, vector<5x8xf32>,
    return
  }
  func.func @transform_0(%arg0: i32) -> (i32, i32) {
    %c0_i32 = arith.constant 0 : i32
    %c0_i32_0 = arith.constant 0 : i32
    %c0_i32_1 = arith.constant 0 : i32
    return %c0_i32, %c0_i32_0 : i32, i32
  }
  func.func @transform_1(%arg0: i32) -> (i32, i32) {
    %c0_i32 = arith.constant 0 : i32
    %c0_i32_0 = arith.constant 0 : i32
    %c0_i32_1 = arith.constant 0 : i32
    return %c0_i32, %c0_i32_0 : i32, i32
  }
  func.func @transform_2(%arg0: i32) -> (i32, i32) {
    %c0_i32 = arith.constant 0 : i32
    %c0_i32_0 = arith.constant 0 : i32
    %c0_i32_1 = arith.constant 0 : i32
    return %c0_i32, %c0_i32_0 : i32, i32
  }
  func.func @transform_3(%arg0: i32) -> (i32, i32) {
    %c0_i32 = arith.constant 0 : i32
    %c0_i32_0 = arith.constant 0 : i32
    %c0_i32_1 = arith.constant 0 : i32
    return %c0_i32, %c0_i32_0 : i32, i32
  }
  func.func @transform_4(%arg0: i32) -> (i32, i32) {
    %c0_i32 = arith.constant 0 : i32
    %c0_i32_0 = arith.constant 0 : i32
    %c0_i32_1 = arith.constant 0 : i32
    return %c0_i32, %c0_i32_0 : i32, i32
  }
  func.func @transform_5(%arg0: i32) -> (i32, i32) {
    %c0_i32 = arith.constant 0 : i32
    %c0_i32_0 = arith.constant 0 : i32
    %c0_i32_1 = arith.constant 0 : i32
    return %c0_i32, %c0_i32_0 : i32, i32
  }
  func.func @transform_6(%arg0: i32) -> (i32, i32) {
    %c0_i32 = arith.constant 0 : i32
    %c0_i32_0 = arith.constant 0 : i32
    %c0_i32_1 = arith.constant 0 : i32
    return %c0_i32, %c0_i32_0 : i32, i32
  }
  func.func @transform_7(%arg0: i32) -> (i32, i32) {
    %c0_i32 = arith.constant 0 : i32
    %c0_i32_0 = arith.constant 0 : i32
    %c0_i32_1 = arith.constant 0 : i32
    return %c0_i32, %c0_i32_0 : i32, i32
  }
  func.func @transform_8(%arg0: i32) -> (i32, i32) {
    %c0_i32 = arith.constant 0 : i32
    %c0_i32_0 = arith.constant 0 : i32
    %c0_i32_1 = arith.constant 0 : i32
    return %c0_i32, %c0_i32_0 : i32, i32
  }
  func.func @transform_9(%arg0: i32) -> (i32, i32) {
    %c0_i32 = arith.constant 0 : i32
    %c0_i32_0 = arith.constant 0 : i32
    %c0_i32_1 = arith.constant 0 : i32
    return %c0_i32, %c0_i32_0 : i32, i32
  }
}

</mosaic_0001>

<bundles_post_ra>
// kernel: tpu_custom_call.1
= control target key start
LH: loop header
LB: loop body
LE: loop exit
PB: predicated region body
PF: predicated region fallthrough
CT: control target
= control target key end

     0   :  { %vm112_vm0 = vcmask 130048   ;;  %v606_v3 = vmov 0   ;;  %s767_s0 = inlined_call_operand.vmem [shape: f32[8,16], index: 0, kind: input, shape index: {}]   ;;  %s768_s1 = inlined_call_operand.vmem [shape: bf16[64,16], index: 1, kind: input, shape index: {}]   ;;  %s769_s2 = inlined_call_operand.vmem [shape: f32[64,1], index: 2, kind: input, shape index: {}]   ;;  %s770_s3 = inlined_call_operand.vmem [shape: bf16[32,64], index: 3, kind: input, shape index: {}]   ;;  %s771_s4 = inlined_call_operand.vmem [shape: f32[32,1], index: 4, kind: input, shape index: {}]   ;;  %s772_s5 = inlined_call_operand.vmem [shape: bf16[32,32], index: 5, kind: input, shape index: {}]   ;;  %s773_s6 = inlined_call_operand.vmem [shape: f32[32,1], index: 6, kind: input, shape index: {}]   ;;  %s774_s7 = inlined_call_operand.vmem [shape: bf16[5,32], index: 7, kind: input, shape index: {}]   ;;  %s775_s8 = inlined_call_operand.vmem [shape: f32[5,1], index: 8, kind: input, shape index: {}]   ;;  %s776_s9 = inlined_call_operand.hbm [shape: f32[5,8], index: 9, kind: output, shape index: {}]  }
   0x1   :  { %v34_v0 = vld [vmem:[%s767_s0] sm:$0xff]  ;;  %568 = vset.pattern.permute.xlu0 %v606_v3  ;;  %569 = vset.pattern.permute.xlu1 %v606_v3  ;;  %v46_v6 = vld [vmem:[%s769_s2 + $0x10] sm:$0xff]  ;;  %v45_v7 = vld [vmem:[%s769_s2 + $0x8] sm:$0xff] }
   0x2   :  { %v35_v1 = vpack.c.bf16 %v34_v0, %v34_v0  ;;  %v570_v2 = vld [vmem:[%s768_s1] sm:$0xff]   ;;  %64 = vperm.xlu1 %569, %v46_v6   ;;  %v571_v8 = vld [vmem:[%s768_s1 + $0x8] sm:$0xff]   ;;  %v47_v9 = vld [vmem:[%s769_s2 + $0x18] sm:$0xff] }
   0x3   :  { %527 = vmatprep.mubr.msk.bf16.mxu0 %vm112_vm0, %v570_v2  ;;  %v44_v5 = vld [vmem:[%s769_s2] sm:$0xff]  ;;  %v572_v10 = vld [vmem:[%s768_s1 + $0x10] sm:$0xff]   ;;  %v49_v12 = vld [vmem:[%s769_s2 + $0x28] sm:$0xff] }
   0x4   :  { %563 = vmatprep.subr.msk.bf16.mxu0 %vm112_vm0, %v35_v1  ;;  %v126_v4 = vsel %vm112_vm0, %v35_v1, 0  ;;  %54 = vperm.xlu0 %568, %v44_v5   ;;  %v48_v11 = vld [vmem:[%s769_s2 + $0x20] sm:$0xff] }
   0x5   :  { %526 = vmatpush3.bf16.xpose.msra.mxu0 %v126_v4 }
   0x6   :  { %69 = vperm.xlu1 %569, %v47_v9  }
   0x8   :  { %59 = vperm.xlu0 %568, %v45_v7  }
   0xc   :  { %528 = vmatmul.mubr.msk.bf16.vlgmr.msra.gmra.mrb[0].mxu0 %vm112_vm0, %v571_v8 }
   0xd   :  { %531 = vmatprep.mubr.msk.bf16.mxu0 %vm112_vm0, %v572_v10 }
   0xe   :  { %14 = vsyncpa [#allocation3], 0  ;;  %74 = vperm.xlu0 %568, %v48_v11   ;;  %v50_v13 = vld [vmem:[%s769_s2 + $0x30] sm:$0xff]  ;;  %79 = vperm.xlu1 %569, %v49_v12   ;;  %v573_v14 = vld [vmem:[%s768_s1 + $0x18] sm:$0xff]   ;;  %vm243_vm1 = vcmask 523264   ;;  %vm343_vm2 = vcmask 261120  }
   0xf   :  { %v51_v15 = vld [vmem:[%s769_s2 + $0x38] sm:$0xff]  ;;  %v209_v16 = vld [vmem:[%s771_s4] sm:$0xff]  ;;  %v210_v17 = vld [vmem:[%s771_s4 + $0x8] sm:$0xff]  ;;  %vm608_vm3 = vmmov 0   ;;  %vm455_vm4 = vcmask 61440  }
  0x10   :  { %v211_v18 = vld [vmem:[%s771_s4 + $0x10] sm:$0xff]  ;;  %v212_v19 = vld [vmem:[%s771_s4 + $0x18] sm:$0xff]  ;;  %v309_v20 = vld [vmem:[%s773_s6] sm:$0xff] }
  0x11   :  { %v310_v21 = vld [vmem:[%s773_s6 + $0x8] sm:$0xff]  ;;  %v311_v22 = vld [vmem:[%s773_s6 + $0x10] sm:$0xff]  ;;  %v312_v23 = vld [vmem:[%s773_s6 + $0x18] sm:$0xff] }
  0x12   :  { %84 = vperm.xlu0 %568, %v50_v13   ;;  %89 = vperm.xlu1 %569, %v51_v15   ;;  %v406_v24 = vld [vmem:[%s775_s8] sm:$0x1f]  ;;  %v575_v62 = vld [vmem:[%s770_s3 + $0x8] sm:$0xff]  }
  0x13   :  { %v574_v25 = vld [vmem:[%s770_s3] sm:$0xff]  }
  0x14   :  { %532 = vmatmul.mubr.msk.bf16.gmra.mrb[4].mxu0 %vm112_vm0, %v573_v14  ;;  %543 = vmatprep.mubr.msk.bf16.mxu1 %vm243_vm1, %v574_v25  ;;  %v576_v63 = vld [vmem:[%s772_s5] sm:$0xff]  }
  0x15   :  { %551 = vmatprep.mubr.msk.bf16.mxu0 %vm343_vm2, %v576_v63 }
  0x16   :  { %215 = vperm.xlu0 %568, %v209_v16   ;;  %220 = vperm.xlu1 %569, %v210_v17  }
  0x1a   :  { %225 = vperm.xlu0 %568, %v211_v18   ;;  %230 = vperm.xlu1 %569, %v212_v19   ;;  %v577_v18 = vld [vmem:[%s772_s5 + $0x8] sm:$0xff]   ;;  %v607_v19 = vmov 0.0  }
  0x1e   :  { %315 = vperm.xlu0 %568, %v309_v20   ;;  %320 = vperm.xlu1 %569, %v310_v21  }
  0x22   :  { %325 = vperm.xlu0 %568, %v311_v22   ;;  %330 = vperm.xlu1 %569, %v312_v23  }
  0x26   :  { %409 = vperm.xlu0 %568, %v406_v24  }
  0x81   :  { %v65_v27 = vpop.permute.xlu1 %64 }
  0x83   :  { %v55_v26 = vpop.permute.xlu0 %54 }
  0x85   :  { %v70_v29 = vpop.permute.xlu1 %69 }
  0x87   :  { %v60_v28 = vpop.permute.xlu0 %59 }
  0x8d   :  { %v75_v33 = vpop.permute.xlu0 %74  ;;  %v80_v38 = vpop.permute.xlu1 %79 }
  0x91   :  { %v85_v45 = vpop.permute.xlu0 %84  ;;  %v90_v50 = vpop.permute.xlu1 %89 }
  0x95   :  { %v216_v0 = vpop.permute.xlu0 %215  ;;  %v221_v1 = vpop.permute.xlu1 %220 }
  0x99   :  { %v226_v2 = vpop.permute.xlu0 %225  ;;  %v231_v6 = vpop.permute.xlu1 %230 }
  0x9d   :  { %v316_v20 = vpop.permute.xlu0 %315  ;;  %v321_v21 = vpop.permute.xlu1 %320 }
  0xa1   :  { %v326_v22 = vpop.permute.xlu0 %325 }
  0xdf   :  { %v529_v30 = vpop.f32.mrb[0].mxu0 }
  0xe0   :  { %v171_v31 = vadd.f32 %v529_v30, %v65_v27  ;;  %v162_v32 = vpop.f32.mrb[1].mxu0 }
  0xe1   :  { %v163_v34 = vadd.f32 %v162_v32, %v55_v26  ;;  %v530_v35 = vpop.f32.mrb[2].mxu0  ;;  %v331_v26 = vpop.permute.xlu1 %330 }
  0xe2   :  { %v174_v36 = vadd.f32 %v530_v35, %v70_v29  ;;  %v165_v37 = vpop.f32.mrb[3].mxu0  ;;  %v195_v40 = vmax.f32 %v171_v31, 0.0 }
  0xe3   :  { %v166_v39 = vadd.f32 %v165_v37, %v60_v28  ;;  %v193_v42 = vmax.f32 %v163_v34, 0.0 }
  0xe4   :  { %v196_v41 = vmax.f32 %v174_v36, 0.0 }
  0xe5   :  { %v194_v43 = vmax.f32 %v166_v39, 0.0  ;;  %v410_v39 = vpop.permute.xlu0 %409 }
  0xe6   :  { %v206_v44 = vpack.c.bf16 %v196_v41, %v195_v40 }
  0xe7   :  { %v533_v46 = vpop.f32.mrb[4].mxu0  ;;  %v205_v47 = vpack.c.bf16 %v194_v43, %v193_v42 }
  0xe8   :  { %v187_v48 = vadd.f32 %v533_v46, %v85_v45  ;;  %v178_v49 = vpop.f32.mrb[5].mxu0 }
  0xe9   :  { %v179_v51 = vadd.f32 %v178_v49, %v75_v33  ;;  %v534_v52 = vpop.f32.mrb[6].mxu0  ;;  %535 = vmatprep.subr.bf16.mxu1 %v205_v47 }
  0xea   :  { %v190_v53 = vadd.f32 %v534_v52, %v90_v50  ;;  %v181_v54 = vpop.f32.mrb[7].mxu0  ;;  %536 = vmatpush3.bf16.msra.mxu1 %v205_v47  ;;  %v199_v56 = vmax.f32 %v187_v48, 0.0 }
  0xeb   :  { %v182_v55 = vadd.f32 %v181_v54, %v80_v38  ;;  %537 = vmatprep.subr.bf16.mxu1 %v206_v44  ;;  %v197_v58 = vmax.f32 %v179_v51, 0.0  ;;  %v403_v38 = vld [vmem:[%s774_s7] sm:$0x7]  ;;  %s609_s7 = smov [#allocation2]  }
  0xec   :  { %v200_v57 = vmax.f32 %v190_v53, 0.0  ;;  %s482_s12 = sshll.u32 %s609_s7, 4  ;;  %s483_s12 = int_to_ptr.vmem [resolvable:$true] %s482_s12 }
  0xed   :  { %v198_v59 = vmax.f32 %v182_v55, 0.0  ;;  %s582_s13 = scalar_lea.vmem %s483_s12, 128  ;;  %p587_p1 = scmp.lt.s32.totalorder %s483_s12, %s483_s12 }
  0xee   :  { %v208_v60 = vpack.c.bf16 %v200_v57, %v199_v56  ;;  %538 = vmatpush3.bf16.msra.mxu1 %v206_v44  ;;  %p583_p0 = scmp.ne.s32.totalorder %s483_s12, %s582_s13  ;;  %p588_p2 = scmp.lt.s32.totalorder %s582_s13, %s582_s13 }
  0xef   :  { %v207_v61 = vpack.c.bf16 %v198_v59, %v197_v58 }
  0xf0   :  { %p589_p3 = por %p588_p2, %p587_p1 }
  0xf1   :  { %539 = vmatprep.subr.bf16.mxu1 %v207_v61 }
  0xf2   :  { %540 = vmatpush3.bf16.msra.mxu1 %v207_v61  ;;  %p590_p4 = pnand %p589_p3, %p583_p0 }
  0xf3   :  { %541 = vmatprep.subr.bf16.mxu1 %v208_v60 }
  0xf6   :  { %542 = vmatpush3.bf16.msra.mxu1 %v208_v60 }
  0xf7   :  { %555 = vmatprep.subr.bf16.mxu1 %v607_v19 }
  0xf9   :  { %544 = vmatmul.mubr.msk.bf16.vlgmr.msra.gmra.mrb[0].mxu1 %vm243_vm1, %v575_v62 }
  0xfa   :  { %559 = vmatprep.mubr.msk.bf16.mxu1 %vm608_vm3, %v607_v19 }
 0x1cc   :  { %v545_v3 = vpop.f32.mrb[0].mxu1 }
 0x1cd   :  { %v293_v4 = vadd.f32 %v545_v3, %v226_v2  ;;  %v284_v5 = vpop.f32.mrb[1].mxu1 }
 0x1ce   :  { %v285_v7 = vadd.f32 %v284_v5, %v216_v0  ;;  %v546_v8 = vpop.f32.mrb[2].mxu1 }
 0x1cf   :  { %v296_v9 = vadd.f32 %v546_v8, %v231_v6  ;;  %v287_v10 = vpop.f32.mrb[3].mxu1  ;;  %v301_v12 = vmax.f32 %v293_v4, 0.0 }
 0x1d0   :  { %v288_v11 = vadd.f32 %v287_v10, %v221_v1  ;;  %v299_v14 = vmax.f32 %v285_v7, 0.0 }
 0x1d1   :  { %v302_v13 = vmax.f32 %v296_v9, 0.0 }
 0x1d2   :  { %v300_v15 = vmax.f32 %v288_v11, 0.0 }
 0x1d3   :  { %v308_v16 = vpack.c.bf16 %v302_v13, %v301_v12 }
 0x1d4   :  { %v307_v17 = vpack.c.bf16 %v300_v15, %v299_v14 }
 0x1d6   :  { %547 = vmatprep.subr.bf16.mxu0 %v307_v17 }
 0x1d7   :  { %548 = vmatpush3.bf16.msra.mxu0 %v307_v17 }
 0x1d8   :  { %549 = vmatprep.subr.bf16.mxu0 %v308_v16 }
 0x1db   :  { %550 = vmatpush3.bf16.msra.mxu0 %v308_v16 }
 0x1de   :  { %552 = vmatmul.mubr.msk.bf16.vlgmr.msra.gmra.mrb[8].mxu0 %vm343_vm2, %v577_v18 }
 0x2b1   :  { %v553_v23 = vpop.f32.mrb[8].mxu0 }
 0x2b2   :  { %v393_v24 = vadd.f32 %v553_v23, %v326_v22  ;;  %v384_v25 = vpop.f32.mrb[9].mxu0 }
 0x2b3   :  { %v385_v27 = vadd.f32 %v384_v25, %v316_v20  ;;  %v554_v28 = vpop.f32.mrb[10].mxu0 }
 0x2b4   :  { %v396_v29 = vadd.f32 %v554_v28, %v331_v26  ;;  %v387_v30 = vpop.f32.mrb[11].mxu0  ;;  %v401_v32 = vmax.f32 %v393_v24, 0.0 }
 0x2b5   :  { %v388_v31 = vadd.f32 %v387_v30, %v321_v21  ;;  %v399_v34 = vmax.f32 %v385_v27, 0.0 }
 0x2b6   :  { %v402_v33 = vmax.f32 %v396_v29, 0.0 }
 0x2b7   :  { %v400_v35 = vmax.f32 %v388_v31, 0.0 }
 0x2b8   :  { %v405_v36 = vpack.c.bf16 %v402_v33, %v401_v32 }
 0x2b9   :  { %v404_v37 = vpack.c.bf16 %v400_v35, %v399_v34 }
 0x2bb   :  { %556 = vmatpush3.bf16.msra.mxu1 %v404_v37 }
 0x2bc   :  { %557 = vmatprep.subr.bf16.mxu1 %v607_v19 }
 0x2bf   :  { %558 = vmatpush3.bf16.msra.mxu1 %v405_v36 }
 0x2c2   :  { %560 = vmatmul.mubr.msk.bf16.vlgmr.msra.gmra.mrb[4].mxu1 %vm343_vm2, %v403_v38 }
 0x395   :  { %v449_v40 = vpop.f32.mrb[4].mxu1 }
 0x396   :  { %v450_v41 = vadd.f32 %v449_v40, %v410_v39  ;;  %v561_v42 = vpop.f32.mrb[5].mxu1 }
 0x397   :  { %v452_v43 = vpop.f32.mrb[6].mxu1 }
 0x398   :  { %v456_v44 = vsel %vm455_vm4, %v450_v41, -inf  ;;  %v562_v45 = vpop.f32.mrb[7].mxu1 }
 0x399   :  { %v457_v46 = vrot.slane %v456_v44, 4 }
 0x39b   :  { %v458_v47 = vmax.f32 %v456_v44, %v457_v46 }
 0x39d   :  { %v459_v48 = vrot.slane %v458_v47, 2 }
 0x39f   :  { %v460_v49 = vmax.f32 %v458_v47, %v459_v48 }
 0x3a1   :  { %v461_v50 = vrot.slane %v460_v49, 1 }
 0x3a3   :  { %v462_v51 = vmax.f32 %v460_v49, %v461_v50 }
 0x3a5   :  { %v463_v52 = vsub.f32 %v450_v41, %v462_v51 }
 0x3a7   :  { %v464_v53 = vmul.f32 1.442695, %v463_v52 }
 0x3a9   :  { %578 = vpow2.f32 %v464_v53 }
 0x3b3   :  { %v579_v54 = vpop.eup %578 }
 0x3b4   :  { %v466_v55 = vsel %vm455_vm4, %v579_v54, 0.0 }
 0x3b5   :  { %v467_v56 = vrot.slane %v466_v55, 4 }
 0x3b7   :  { %v468_v57 = vadd.f32 %v467_v56, %v466_v55 }
 0x3b9   :  { %v469_v58 = vrot.slane %v468_v57, 2 }
 0x3bb   :  { %v470_v59 = vadd.f32 %v469_v58, %v468_v57 }
 0x3bd   :  { %v471_v60 = vrot.slane %v470_v59, 1 }
 0x3bf   :  { %v472_v61 = vadd.f32 %v471_v60, %v470_v59 }
 0x3c1   :  { %580 = vrcp.f32 %v472_v61 }
 0x3cb   :  { %v581_v62 = vpop.eup %580 }
 0x3cc   :  { %v474_v63 = vmul.f32 %v581_v62, %v579_v54 }
 0x3ce   :  { %475 = vst.msk [vmem:[#allocation2] sm:$0x1f] %vm455_vm4, %v474_v63 }
 0x3cf   :  { %593 = shalt.err (!%p590_p4)
}
 0x3d0   :  { %s594_s15 = scalar_lea.hbm %s776_s9, 128 }
 0x3d1   :  { %p595_p5 = scmp.ne.s32.totalorder %s776_s9, %s594_s15  ;;  %p598_p6 = scmp.lt.u32.totalorder %s594_s15, %s776_s9 }
 0x3d3   :  { %p600_p7 = pnand %p598_p6, %p595_p5 }
 0x3d5   :  { %603 = shalt.err (!%p600_p7)
}
 0x3d6   :  { %485 = dma.vmem_to_hbm [thread:$0]  %s483_s12, 128, %s776_s9, [#allocation3]  }
 0x3d7   :  { %604 = dma.done.wait [#allocation3], 128  }
 0x3d8   :  { %605 = vsyncadd [#allocation3], 4294967168 }
 0x3d9   :  { %489 = vsyncpa [#allocation3], 1 }

</bundles_post_ra>
